<compile_context>
chip_gen: v7x
topology: tpu7x:2x2x1
jax: 0.10.0
libtpu: 0.0.40
codegen_flags: <defaults>
</compile_context>

<pallas_src>
import jax
import jax.numpy as jnp
from jax.experimental import pallas as pl
from jax.experimental.pallas import tpu as pltpu


def linear_relu_kernel(x_ref, w_ref, b_ref, o_ref):
    # One batch tile: out = relu(x @ W + b).  MXU matmul, f32 accumulation.
    acc = jnp.dot(x_ref[...], w_ref[...], preferred_element_type=jnp.float32)
    acc = acc + b_ref[...]                              # broadcast bias over rows
    o_ref[...] = jnp.maximum(acc, 0.0).astype(o_ref.dtype)


def net_common_forward(x, w, b, *, block_b=1024, input_dtype=None):
    """Pallas Net_common.forward: relu(x @ W + b).

    Args:
      x: (B, n_feature) float32
      w: (n_feature, 32) float32  (transposed relative to the torch weight)
      b: (32,) float32
      block_b: batch tile size in rows (must be a multiple of 8).
      input_dtype: optionally cast x/w (e.g. jnp.bfloat16).  NOTE: this
        quantizes inputs before the MXU; only use if the caller tolerates the
        reduced precision (default f32 keeps tight numerics).
    Returns:
      (B, 32) float32
    """
    B, F = x.shape
    H = w.shape[1]

    if input_dtype is not None:
        x = x.astype(input_dtype)
        w = w.astype(input_dtype)

    # Bias as a (1, H) row so the in-kernel add broadcasts over batch rows.
    b2 = b.reshape(1, H).astype(jnp.float32)

    # Bytes actually moved by this layout: x read + W read + b read + out write.
    cost = pl.CostEstimate(
        flops=2 * B * F * H,
        transcendentals=0,
        bytes_accessed=(x.size * x.dtype.itemsize
                        + w.size * w.dtype.itemsize
                        + b2.size * b2.dtype.itemsize
                        + B * H * 4),
    )

    num_tiles = pl.cdiv(B, block_b)

    if num_tiles == 1:
        # Tiny case: whole problem fits in one VMEM tile; skip the grid loop
        # and BlockSpec index-map machinery entirely.
        return pl.pallas_call(
            linear_relu_kernel,
            out_shape=jax.ShapeDtypeStruct((B, H), jnp.float32),
            in_specs=[
                pl.BlockSpec(memory_space=pltpu.MemorySpace.VMEM),
                pl.BlockSpec(memory_space=pltpu.MemorySpace.VMEM),
                pl.BlockSpec(memory_space=pltpu.MemorySpace.VMEM),
            ],
            out_specs=pl.BlockSpec(memory_space=pltpu.MemorySpace.VMEM),
            cost_estimate=cost,
        )(x, w, b2)

    # Real batch sizes: stream large x tiles (partial final block handled by
    # Pallas, no padding pass over x), keep W/b VMEM-resident (constant block
    # index), parallel batch axis for v7x megacore.
    tb = block_b
    # TODO(synk): on v7x, try pltpu.CORE_PARALLEL for the batch axis and verify
    # with xprof that both TensorCores receive tiles.
    return pl.pallas_call(
        linear_relu_kernel,
        out_shape=jax.ShapeDtypeStruct((B, H), jnp.float32),
        grid_spec=pltpu.PrefetchScalarGridSpec(
            num_scalar_prefetch=0,
            grid=(num_tiles,),
            in_specs=[
                pl.BlockSpec((tb, F), lambda i: (i, 0)),   # x: streamed
                pl.BlockSpec((F, H), lambda i: (0, 0)),    # W: VMEM-resident
                pl.BlockSpec((1, H), lambda i: (0, 0)),    # b: VMEM-resident
            ],
            out_specs=pl.BlockSpec((tb, H), lambda i: (i, 0)),
        ),
        compiler_params=pltpu.CompilerParams(
            dimension_semantics=("parallel",),
        ),
        cost_estimate=cost,
    )(x, w, b2)


def init_params(key, n_feature, hidden=32):
    # Deterministic init mimicking torch.nn.Linear default
    # (uniform in [-1/sqrt(fan_in), 1/sqrt(fan_in)]).
    kw, kb = jax.random.split(key)
    bound = 1.0 / jnp.sqrt(jnp.float32(n_feature))
    w = jax.random.uniform(kw, (n_feature, hidden), jnp.float32, -bound, bound)
    b = jax.random.uniform(kb, (hidden,), jnp.float32, -bound, bound)
    return w, b


if __name__ == "__main__":
    key = jax.random.PRNGKey(0)
    kx, kp, kx2 = jax.random.split(key, 3)

    n_feature = 10  # diabetes dataset has 10 features
    w, b = init_params(kp, n_feature, hidden=32)

    # Small shape (single-tile / no-grid path), matching the toy spec.
    batch = 8
    x = jax.random.normal(kx, (batch, n_feature), jnp.float32)
    out = jax.block_until_ready(net_common_forward(x, w, b))
    ref = jnp.maximum(x @ w + b, 0.0)
    assert out.shape == (batch, 32)
    assert jnp.allclose(out, ref, atol=1e-4, rtol=1e-5)

    # Larger, non-multiple-of-tile batch exercises the tiled (grid) path with
    # a partial final block: 2500 rows -> 3 tiles of 1024 (last one partial).
    big_batch = 2500
    x_big = jax.random.normal(kx2, (big_batch, n_feature), jnp.float32)
    out_big = jax.block_until_ready(net_common_forward(x_big, w, b))
    ref_big = jnp.maximum(x_big @ w + b, 0.0)
    assert out_big.shape == (big_batch, 32)
    assert jnp.allclose(out_big, ref_big, atol=1e-4, rtol=1e-5)
    assert bool(jnp.all(jnp.isfinite(out_big)))

    print("KERNEL_OK")
</pallas_src>

<mosaic_0001>
module attributes {stable_mosaic.version = 11 : i64} {
  func.func @linear_relu_kernel(%arg0: memref<8x10xf32, #tpu.memory_space<vmem>>, %arg1: memref<10x32xf32, #tpu.memory_space<vmem>>, %arg2: memref<1x32xf32, #tpu.memory_space<vmem>>, %arg3: memref<8x32xf32, #tpu.memory_space<vmem>>) attributes {dimension_semantics = [], scalar_prefetch = 0 : i64, scratch_operands = 0 : i64, tpu.core_type = #tpu.core_type<tc>} {
    %c0 = arith.constant 0 : index
    %c0_0 = arith.constant 0 : index
    %0 = vector.load %arg0[%c0, %c0_0] : memref<8x10xf32, #tpu.memory_space<vmem>>, vector<8x10xf32>
    %c0_1 = arith.constant 0 : index
    %c0_2 = arith.constant 0 : index
    %1 = vector.load %arg1[%c0_1, %c0_2] : memref<10x32xf32, #tpu.memory_space<vmem>>, vector<10x32xf32>
    %cst = arith.constant dense<0.000000e+00> : vector<8x32xf32>
    %2 = tpu.matmul %0, %1, %cst {dimension_numbers = #tpu.dot_dimension_numbers<[1], [0], [0], [1], [0, 0, 1, 1], [], []>} : vector<8x10xf32>, vector<10x32xf32>, vector<8x32xf32> -> vector<8x32xf32>
    %c0_3 = arith.constant 0 : index
    %c0_4 = arith.constant 0 : index
    %3 = vector.load %arg2[%c0_3, %c0_4] : memref<1x32xf32, #tpu.memory_space<vmem>>, vector<1x32xf32>
    %4 = vector.broadcast %3 : vector<1x32xf32> to vector<8x32xf32>
    %5 = arith.addf %2, %4 : vector<8x32xf32>
    %cst_5 = arith.constant 0.000000e+00 : f32
    %6 = vector.broadcast %cst_5 : f32 to vector<8x32xf32>
    %7 = arith.maximumf %5, %6 : vector<8x32xf32>
    %c0_6 = arith.constant 0 : index
    %c0_7 = arith.constant 0 : index
    %8 = vector.load %arg3[%c0_6, %c0_7] : memref<8x32xf32, #tpu.memory_space<vmem>>, vector<8x32xf32>
    tpu.vector_store %arg3[%c0_6, %c0_7], %7 {strides = array<i32>} : memref<8x32xf32, #tpu.memory_space<vmem>>, vector<8x32xf32>,
    return
  }
}

</mosaic_0001>

<bundles_post_ra>
// kernel: tpu_custom_call.1
= control target key start
LH: loop header
LB: loop body
LE: loop exit
PB: predicated region body
PF: predicated region fallthrough
CT: control target
= control target key end

     0   :  { %8 = vsyncpa [#allocation3], 0  ;;  %s321_s0 = inlined_call_operand.hbm [shape: f32[8,10], index: 0, kind: input, shape index: {}]   ;;  %s322_s1 = inlined_call_operand.hbm [shape: f32[10,32], index: 1, kind: input, shape index: {}]   ;;  %s323_s2 = inlined_call_operand.vmem [shape: f32[1,32], index: 2, kind: input, shape index: {}]   ;;  %s324_s3 = inlined_call_operand.hbm [shape: f32[8,32], index: 3, kind: output, shape index: {}]  }
   0x1   :  { %9 = vsyncpa [#allocation6], 0 }
   0x2   :  { %10 = vsyncpa [#allocation4], 0  ;;  %s246_s12 = smov [#allocation2]   ;;  %s247_s14 = smov [#allocation5]  }
   0x3   :  { %s17_s13 = sshll.u32 %s246_s12, 4  ;;  %s26_s15 = sshll.u32 %s247_s14, 4  ;;  %s18_s13 = int_to_ptr.vmem [resolvable:$true] %s17_s13  ;;  %s275_s15 = int_to_ptr.vmem [resolvable:$true] %s26_s15 }
   0x4   :  { %s174_s18 = scalar_lea.hbm %s321_s0, 128 }
   0x5   :  { %p175_p0 = scmp.ne.s32.totalorder %s321_s0, %s174_s18  ;;  %p178_p1 = scmp.lt.u32.totalorder %s174_s18, %s321_s0 }
   0x7   :  { %p180_p2 = pnand %p178_p1, %p175_p0 }
   0x9   :  { %183 = shalt.err (!%p180_p2)
}
   0xa   :  { %s184_s23 = scalar_lea.vmem %s18_s13, 128  ;;  %p189_p4 = scmp.lt.s32.totalorder %s18_s13, %s18_s13 }
   0xb   :  { %p185_p3 = scmp.ne.s32.totalorder %s18_s13, %s184_s23  ;;  %p190_p5 = scmp.lt.s32.totalorder %s184_s23, %s184_s23 }
   0xd   :  { %p191_p6 = por %p190_p5, %p189_p4 }
   0xf   :  { %p192_p7 = pnand %p191_p6, %p185_p3 }
  0x11   :  { %195 = shalt.err (!%p192_p7)
}
  0x12   :  { %20 = dma.hbm_to_vmem [thread:$0]  %s321_s0, 128, %s18_s13, [#allocation3]  }
  0x13   :  { %s196_s28 = scalar_lea.hbm %s322_s1, 256 }
  0x14   :  { %p197_p8 = scmp.ne.s32.totalorder %s322_s1, %s196_s28  ;;  %p200_p9 = scmp.lt.u32.totalorder %s196_s28, %s322_s1 }
  0x16   :  { %p202_p10 = pnand %p200_p9, %p197_p8 }
  0x18   :  { %205 = shalt.err (!%p202_p10)
}
  0x19   :  { %s206_s6 = scalar_lea.vmem %s275_s15, 256  ;;  %p211_p12 = scmp.lt.s32.totalorder %s275_s15, %s275_s15 }
  0x1a   :  { %p207_p11 = scmp.ne.s32.totalorder %s275_s15, %s206_s6  ;;  %p212_p13 = scmp.lt.s32.totalorder %s206_s6, %s206_s6 }
  0x1c   :  { %p213_p0 = por %p212_p13, %p211_p12 }
  0x1e   :  { %p214_p1 = pnand %p213_p0, %p207_p11 }
  0x20   :  { %217 = shalt.err (!%p214_p1)
}
  0x21   :  { %s248_s0 = smov 128   ;;  %s249_s7 = smov 8  }
  0x22   :  { %32 = dma.hbm_to_vmem [thread:$0]  %s322_s1, 256, %s275_s15, [#allocation6], %s248_s0, %s248_s0, %s249_s7  }
  0x23   :  { %240 = dma.done.wait [#allocation3], 128  }
  0x24   :  { %241 = vsyncadd [#allocation3], 4294967168 }
  0x25   :  { %242 = dma.done.wait [#allocation6], 256  }
  0x26   :  { %243 = vsyncadd [#allocation6], 4294967040  ;;  %v250_v0 = vmov 0.0|0.0   ;;  %vm251_vm0 = vmmov 0   ;;  %v252_v1 = vmov 0.0   ;;  %vm55_vm1 = vcmask 1041408  }
  0x27   :  { %161 = vmatprep.subr.bf16.mxu0 %v250_v0  ;;  %158 = vmatprep.mubr.msk.f32.mxu0 %vm251_vm0, %v252_v1  ;;  %v42_v2 = vld [vmem:[#allocation5] sm:$0xff]  ;;  %v43_v3 = vld [vmem:[#allocation5 + $0x8] sm:$0x3]  ;;  %vm253_vm2 = vmmov 1   ;;  %v41_v5 = vld [vmem:[#allocation2] sm:$0xff]  ;;  %vm51_vm4 = vcmask 80896  }
  0x28   :  { %vm163_vm3 = vmpackc.low %vm55_vm1, %vm253_vm2  ;;  %v162_v4 = vpack.c.bf16 %v43_v3, %v42_v2  ;;  %v148_v6 = vld [vmem:[%s323_s2] ss:$0 sm:$0xff]  ;;  %s254_s11 = smov [#allocation7]   ;;  %vm130_vm5 = vcmask 261120  }
  0x29   :  { %s138_s12 = sshll.u32 %s254_s11, 4  ;;  %s139_s12 = int_to_ptr.vmem [resolvable:$true] %s138_s12 }
  0x2a   :  { %164 = vmatpush3.bf16.msk.msra.mxu0 %vm163_vm3, %v162_v4  ;;  %s218_s13 = scalar_lea.vmem %s139_s12, 128  ;;  %p223_p3 = scmp.lt.s32.totalorder %s139_s12, %s139_s12 }
  0x2b   :  { %p219_p2 = scmp.ne.s32.totalorder %s139_s12, %s218_s13  ;;  %p224_p4 = scmp.lt.s32.totalorder %s218_s13, %s218_s13 }
  0x2d   :  { %159 = vmatmul.mubr.msk.f32.vlgmr.msra.gmra.mrb[0].mxu0 %vm51_vm4, %v41_v5  ;;  %p225_p5 = por %p224_p4, %p223_p3 }
  0x2f   :  { %p226_p6 = pnand %p225_p5, %p219_p2 }
 0x100   :  { %v125_v7 = vpop.f32.mrb[0].mxu0 }
 0x101   :  { %v126_v8 = vadd.f32 %v148_v6, %v125_v7  ;;  %v160_v9 = vpop.f32.mrb[1].mxu0 }
 0x103   :  { %v129_v10 = vmax.f32 %v126_v8, 0.0 }
 0x105   :  { %131 = vst.msk [vmem:[#allocation7] sm:$0xff] %vm130_vm5, %v129_v10 }
 0x106   :  { %229 = shalt.err (!%p226_p6)
}
 0x107   :  { %s230_s2 = scalar_lea.hbm %s324_s3, 128 }
 0x108   :  { %p231_p7 = scmp.ne.s32.totalorder %s324_s3, %s230_s2  ;;  %p234_p8 = scmp.lt.u32.totalorder %s230_s2, %s324_s3 }
 0x10a   :  { %p236_p9 = pnand %p234_p8, %p231_p7 }
 0x10c   :  { %239 = shalt.err (!%p236_p9)
}
 0x10d   :  { %141 = dma.vmem_to_hbm [thread:$0]  %s139_s12, 128, %s324_s3, [#allocation4]  }
 0x10e   :  { %244 = dma.done.wait [#allocation4], 128  }
 0x10f   :  { %245 = vsyncadd [#allocation4], 4294967168 }
 0x110   :  { %145 = vsyncpa [#allocation3], 1 }
 0x111   :  { %146 = vsyncpa [#allocation6], 1 }
 0x112   :  { %147 = vsyncpa [#allocation4], 1 }

</bundles_post_ra>
